<compile_context>
chip_gen: v6e
topology: v6e:2x2x1
jax: 0.10.0
libtpu: 0.0.40
codegen_flags: <defaults>
</compile_context>

<pallas_src>
import functools

import jax
import jax.numpy as jnp
from jax.experimental import pallas as pl
from jax.experimental.pallas import tpu as pltpu


def _add_noise_kernel(w_ref, x_ref, nz_ref, o_ref):
    # w_ref : (1, C, 1)    per-channel scale for the selected class (grid-resident)
    # x_ref : (Nb, C, T)   lane tile of Nb batch elements
    # nz_ref: (Nb, 1, T)   matching noise tile (broadcast over channels)
    # o_ref : (Nb, C, T)
    o_ref[...] = x_ref[...] + w_ref[...] * nz_ref[...]


def _round_up(x, m):
    return ((x + m - 1) // m) * m


def _vmem_budget():
    """Generation-aware (tiling_budget_bytes, vmem_limit_bytes)."""
    try:
        cap = pltpu.get_tpu_info().vmem_capacity_bytes
    except Exception:
        cap = 64 * 1024 * 1024
    if cap >= 96 * 1024 * 1024:
        # v5e / v6e: 128 MiB physical VMEM -> large tiles, plenty of headroom.
        return 40 * 1024 * 1024, 64 * 1024 * 1024
    # v7x: 64 MiB per TensorCore, but ~3.2 TB/s HBM -> still want big tiles.
    return 22 * 1024 * 1024, 44 * 1024 * 1024


def _pick_blocks(N, C, HW, itemsize, budget_bytes):
    """Pick (Nb, lane_tile) so double-buffered x+out+noise fits the VMEM budget,
    accounting for sublane/lane padding of the VMEM layout."""
    sub = max(8, 32 // itemsize)            # sublane tile: 8 (f32), 16 (bf16), 32 (i8)
    hw128 = _round_up(max(HW, 1), 128)
    c_pad = _round_up(C, sub)

    # Resident (1, C, 1) weight block lane-pads to 128 and is double-buffered.
    w_bytes = 2 * c_pad * 128 * itemsize
    budget = max(budget_bytes - w_bytes, 2 * 1024 * 1024)

    # Double-buffered bytes per lane column per batch element: x + out + noise.
    rows = 2 * c_pad + sub
    per_lane = 2 * rows * itemsize

    # Largest lane tile (multiple of 128) fitting the budget with Nb = 1.
    tile = (budget // per_lane // 128) * 128
    tile = max(128, min(tile, hw128))

    nb = 1
    if tile >= hw128:
        # One block covers all of HW: use the exact extent (no masking needed)
        # and amortize step overhead by blocking batch elements.
        tile = HW
        per_batch = per_lane * hw128        # VMEM footprint still pads to 128 lanes
        nb = int(max(1, min(N, budget // max(per_batch, 1))))
        # Keep >= 2 grid steps when N > 1 so v7x can use both TensorCores.
        if nb >= N and N > 1:
            nb = (N + 1) // 2
    return nb, tile


@functools.partial(jax.jit, static_argnames=("nb", "tile", "vmem_limit"))
def _add_noise_forward(x, noise, w, *, nb, tile, vmem_limit):
    N, C, H, W = x.shape
    HW = H * W
    x3 = x.reshape(N, C, HW)       # free layout metadata inside jit
    nz3 = noise.reshape(N, 1, HW)
    w3 = w.reshape(1, C, 1)

    grid = (pl.cdiv(N, nb), pl.cdiv(HW, tile))
    out3 = pl.pallas_call(
        _add_noise_kernel,
        out_shape=jax.ShapeDtypeStruct((N, C, HW), x.dtype),
        grid_spec=pltpu.PrefetchScalarGridSpec(
            num_scalar_prefetch=0,
            grid=grid,
            in_specs=[
                # weight: same tiny block every step -> stays resident
                pl.BlockSpec((1, C, 1), lambda b, s: (0, 0, 0)),
                # x: (Nb, C, tile) lane tile; partial blocks padded/masked by Pallas
                pl.BlockSpec((nb, C, tile), lambda b, s: (b, 0, s)),
                # noise: matching (Nb, 1, tile) tile
                pl.BlockSpec((nb, 1, tile), lambda b, s: (b, 0, s)),
            ],
            out_specs=pl.BlockSpec((nb, C, tile), lambda b, s: (b, 0, s)),
        ),
        compiler_params=pltpu.CompilerParams(
            dimension_semantics=("parallel", "parallel"),
            vmem_limit_bytes=vmem_limit,
        ),
    )(w3, x3, nz3)
    return out3.reshape(N, C, H, W)


class AddNoise:
    """JAX/Pallas port of the PyTorch AddNoise module (NCHW semantics)."""

    def __init__(self, channels, class_num, key):
        # PyTorch __init__ uses torch.zeros(channels) per class; keep the same
        # shapes but initialize with small non-zero values so the kernel path
        # is actually exercised in the test (zeros would degenerate to a copy).
        keys = jax.random.split(key, class_num)
        self.weights = [
            0.1 * jax.random.normal(k, (channels,), dtype=jnp.float32)
            for k in keys
        ]

    def __call__(self, x, noise, class_num, *, noise_key=None):
        N, C, H, W = x.shape
        if noise is None:
            if noise_key is None:
                noise_key = jax.random.PRNGKey(0)
            # TODO(synk): generate the noise in-kernel with pltpu.prng_seed +
            # pltpu.prng_random_bits (+ bits->normal transform) to avoid one full
            # HBM write/read of the (N,1,H,W) noise tensor on this bandwidth-bound op.
            noise = jax.random.normal(noise_key, (N, 1, H, W), dtype=x.dtype)
        w = self.weights[class_num].astype(x.dtype)

        itemsize = jnp.dtype(x.dtype).itemsize
        budget, vmem_limit = _vmem_budget()
        nb, tile = _pick_blocks(N, C, H * W, itemsize, budget)
        return _add_noise_forward(x, noise, w, nb=nb, tile=tile,
                                  vmem_limit=vmem_limit)


def _reference(x, noise, w):
    return x + w.reshape(1, -1, 1, 1) * noise


if __name__ == "__main__":
    key = jax.random.PRNGKey(0)
    k_x, k_n, k_w = jax.random.split(key, 3)

    N, C, H, W = 2, 4, 16, 16
    class_num_total = 3
    class_idx = 1

    x = jax.random.normal(k_x, (N, C, H, W), dtype=jnp.float32)
    noise = jax.random.normal(k_n, (N, 1, H, W), dtype=jnp.float32)

    mod = AddNoise(C, class_num_total, k_w)

    out = jax.block_until_ready(mod(x, noise, class_idx))
    ref = _reference(x, noise, mod.weights[class_idx])
    assert out.shape == (N, C, H, W)
    assert jnp.allclose(out, ref, atol=1e-6, rtol=1e-6), "mismatch vs reference"

    # non-multiple-of-128 spatial size exercises the partial (masked) block path
    H2, W2 = 10, 13
    x2 = jax.random.normal(k_x, (N, C, H2, W2), dtype=jnp.float32)
    n2 = jax.random.normal(k_n, (N, 1, H2, W2), dtype=jnp.float32)
    out_pad = jax.block_until_ready(mod(x2, n2, 0))
    ref_pad = _reference(x2, n2, mod.weights[0])
    assert jnp.allclose(out_pad, ref_pad, atol=1e-6, rtol=1e-6), "mismatch (partial)"

    # also exercise the noise=None branch
    out2 = jax.block_until_ready(mod(x, None, 0, noise_key=k_n))
    assert out2.shape == (N, C, H, W)

    print("KERNEL_OK")
</pallas_src>

<mosaic_0001>
module attributes {stable_mosaic.version = 11 : i64} {
  func.func @_add_noise_kernel(%arg0: i32, %arg1: i32, %arg2: memref<1x4x1xf32, #tpu.memory_space<vmem>>, %arg3: memref<1x4x256xf32, #tpu.memory_space<vmem>>, %arg4: memref<1x1x256xf32, #tpu.memory_space<vmem>>, %arg5: memref<1x4x256xf32, #tpu.memory_space<vmem>>) attributes {dimension_semantics = [#tpu.dimension_semantics<parallel>, #tpu.dimension_semantics<parallel>], iteration_bounds = array<i64: 2, 1>, scalar_prefetch = 0 : i64, scratch_operands = 0 : i64, tpu.core_type = #tpu.core_type<tc>, window_params = [{pipeline_mode = #tpu.pipeline_mode<synchronous>, transform_indices = @transform_0, window_bounds = array<i64: 1, 4, 1>}, {transform_indices = @transform_1, window_bounds = array<i64: 1, 4, 256>}, {transform_indices = @transform_2, window_bounds = array<i64: 1, 1, 256>}, {transform_indices = @transform_3, window_bounds = array<i64: 1, 4, 256>}]} {
    %c0 = arith.constant 0 : index
    %c0_0 = arith.constant 0 : index
    %c0_1 = arith.constant 0 : index
    %0 = vector.load %arg3[%c0, %c0_0, %c0_1] : memref<1x4x256xf32, #tpu.memory_space<vmem>>, vector<1x4x256xf32>
    %c0_2 = arith.constant 0 : index
    %c0_3 = arith.constant 0 : index
    %c0_4 = arith.constant 0 : index
    %1 = vector.load %arg2[%c0_2, %c0_3, %c0_4] : memref<1x4x1xf32, #tpu.memory_space<vmem>>, vector<1x4x1xf32>
    %c0_5 = arith.constant 0 : index
    %c0_6 = arith.constant 0 : index
    %c0_7 = arith.constant 0 : index
    %2 = vector.load %arg4[%c0_5, %c0_6, %c0_7] : memref<1x1x256xf32, #tpu.memory_space<vmem>>, vector<1x1x256xf32>
    %3 = vector.broadcast %1 : vector<1x4x1xf32> to vector<1x4x256xf32>
    %4 = vector.broadcast %2 : vector<1x1x256xf32> to vector<1x4x256xf32>
    %5 = arith.mulf %3, %4 : vector<1x4x256xf32>
    %6 = arith.addf %0, %5 : vector<1x4x256xf32>
    %c0_8 = arith.constant 0 : index
    %c0_9 = arith.constant 0 : index
    %c0_10 = arith.constant 0 : index
    %7 = vector.load %arg5[%c0_8, %c0_9, %c0_10] : memref<1x4x256xf32, #tpu.memory_space<vmem>>, vector<1x4x256xf32>
    tpu.vector_store %arg5[%c0_8, %c0_9, %c0_10], %6 {strides = array<i32>} : memref<1x4x256xf32, #tpu.memory_space<vmem>>, vector<1x4x256xf32>,
    return
  }
  func.func @transform_0(%arg0: i32, %arg1: i32) -> (i32, i32, i32) {
    %c0_i32 = arith.constant 0 : i32
    %c0_i32_0 = arith.constant 0 : i32
    %c0_i32_1 = arith.constant 0 : i32
    %c0_i32_2 = arith.constant 0 : i32
    return %c0_i32, %c0_i32_0, %c0_i32_1 : i32, i32, i32
  }
  func.func @transform_1(%arg0: i32, %arg1: i32) -> (i32, i32, i32) {
    %c0_i32 = arith.constant 0 : i32
    %c0_i32_0 = arith.constant 0 : i32
    return %arg0, %c0_i32, %arg1 : i32, i32, i32
  }
  func.func @transform_2(%arg0: i32, %arg1: i32) -> (i32, i32, i32) {
    %c0_i32 = arith.constant 0 : i32
    %c0_i32_0 = arith.constant 0 : i32
    return %arg0, %c0_i32, %arg1 : i32, i32, i32
  }
  func.func @transform_3(%arg0: i32, %arg1: i32) -> (i32, i32, i32) {
    %c0_i32 = arith.constant 0 : i32
    %c0_i32_0 = arith.constant 0 : i32
    return %arg0, %c0_i32, %arg1 : i32, i32, i32
  }
}

</mosaic_0001>

<bundles_post_ra>
// kernel: _add_noise_forward.1
= control target key start
LH: loop header
LB: loop body
LE: loop exit
PB: predicated region body
PF: predicated region fallthrough
CT: control target
= control target key end

     0   :  { %s457_s12 = smov 0   ;;  %s459_s13 = smov 0   ;;  %s496_s0 = inlined_call_operand.vmem [shape: f32[1,4,1], index: 0, kind: input, shape index: {}]   ;;  %s497_s1 = inlined_call_operand.vmem [shape: f32[2,4,256], index: 1, kind: input, shape index: {}]   ;;  %s498_s2 = inlined_call_operand.vmem [shape: f32[2,1,256], index: 2, kind: input, shape index: {}]   ;;  %s499_s3 = inlined_call_operand.vmem [shape: f32[2,4,256], index: 3, kind: output, shape index: {}]  }
   0x1   :  { %s461_s14 = smov 0  }
   0x2 LB: > { %s25_s15 = sadd.s32 1, %s430_s13  ;;  %p376_p0 = scmp.ge.s32.totalorder %s434_s14, 1  ;;  %s434_s14 = sphi %s461_s14, %s13_s14   ;;  %s430_s13 = sphi %s459_s13, %s501_s13   ;;  %s426_s12 = sphi %s457_s12, %s500_s12  }
   0x3   : > { %p27_p1 = scmp.ge.s32.totalorder %s25_s15, 2  ;;  %p174_p2 = scmp.lt.s32.totalorder %s434_s14, 3 }
   0x5   : > { %s503_s15 = smov (%p27_p1, %s25_s15), 0  ;;  %p175_p3 = pnand %p376_p0, %p174_p2 }
   0x6   : > { %p215_p4 = scmp.lt.s32.totalorder (!%p175_p3), %s426_s12, 1 }
   0x7   : > { %178 = sbr.rel (%p175_p3) target bundleno = 145 (0x91), region = 32 }
   0xc   : > { %v244_v0 = vld [vmem:[%s496_s0] sm:$0xf]  ;;  %v436_v1 = vmov 0   ;;  %s505_s12 = smov (!%p215_p4, %s426_s12), 1  ;;  %v252_v2 = vlaneseq }
   0xd   : > { %411 = vset.pattern.permute.xlu0 %v436_v1  ;;  %s379_s18 = sshll.u32 %s505_s12, 1  ;;  %s384_s22 = sshll.u32 %s505_s12, 3 }
   0xe   : > { %248 = vperm.xlu0 %411, %v244_v0   ;;  %v253_v3 = vshrl.u32 %v252_v2, 7  ;;  %s231_s21 = scalar_lea.vmem %s498_s2, %s379_s18  ;;  %s222_s25 = scalar_lea.vmem %s497_s1, %s384_s22 }
   0xf   : > { %v245_v6 = vld [vmem:[%s231_s21] sm:$0x3]  ;;  %s241_s28 = scalar_lea.vmem %s499_s3, %s384_s22 }
  0x10   : > { %v254_v4 = vsub.s32 0, %v253_v3  ;;  %v258_v5 = vsub.s32 1, %v253_v3  ;;  %v243_v12 = vld [vmem:[%s222_s25] sm:$0xff] }
  0x12   : > { %v255_v7 = vrot.slane %v245_v6, %v254_v4  ;;  %v259_v8 = vrot.slane %v245_v6, %v258_v5 }
  0x89   : > { %v249_v9 = vpop.permute.xlu0 %248 }
  0x8a   : > { %v262_v10 = vmul.f32 %v255_v7, %v249_v9  ;;  %v263_v11 = vmul.f32 %v259_v8, %v249_v9 }
  0x8c   : > { %v266_v13 = vcombine.low %v262_v10, %v263_v11 }
  0x8e   : > { %v268_v14 = vadd.f32 %v266_v13, %v243_v12 }
  0x90   : > { %269 = vst [vmem:[%s241_s28] sm:$0xff] %v268_v14 }
  0x91 PF: > { %s13_s14 = sadd.s32 1, %s434_s14   ;;  %s500_s12 = smov %s430_s13 }
  0x92   : > { %p10_p5 = scmp.ge.s32.totalorder %s13_s14, 4   ;;  %s501_s13 = smov %s503_s15 }
  0x94   :  { %12 = sbr.rel (!%p10_p5) target bundleno = 2 (0x2), region = 65 }

</bundles_post_ra>
